<compile_context>
chip_gen: v7x
topology: tpu7x:2x2x1
jax: 0.10.0
libtpu: 0.0.40
codegen_flags: <defaults>
</compile_context>

<pallas_src>
import functools
import math

import jax
import jax.numpy as jnp
from jax import lax
from jax.experimental import pallas as pl
from jax.experimental.pallas import tpu as pltpu


def _round_up(x, m):
    return (x + m - 1) // m * m


# ----------------------------------------------------------------------------
# Bilinear (align_corners=True) interpolation weight matrix: (out_size, in_size)
# ----------------------------------------------------------------------------
def bilinear_weights(out_size, in_size):
    if out_size == 1:
        src = jnp.zeros((1,), jnp.float32)
    else:
        src = jnp.arange(out_size, dtype=jnp.float32) * (
            (in_size - 1) / (out_size - 1)
        )
    lo = jnp.floor(src).astype(jnp.int32)
    hi = jnp.minimum(lo + 1, in_size - 1)
    frac = src - lo.astype(jnp.float32)
    return (
        jax.nn.one_hot(lo, in_size, dtype=jnp.float32) * (1.0 - frac)[:, None]
        + jax.nn.one_hot(hi, in_size, dtype=jnp.float32) * frac[:, None]
    )


# ----------------------------------------------------------------------------
# Kernel 1: bilinear upsample of a block of channel planes (two MXU matmuls)
#   in : (Cblk, Hin, Win)   out: (Cblk, Wout, Hout)   (spatial order (w, h))
# ----------------------------------------------------------------------------
def _upsample_kernel(x_ref, wwT_ref, whT_ref, u_ref, *,
                     Cblk, Hin, Win, Hout, Wout, mxu_dtype):
    x = x_ref[...]                                               # (Cblk, Hin, Win)
    # width pass: one (Cblk*Hin, Win) @ (Win, Wout) matmul
    t = jnp.dot(x.reshape(Cblk * Hin, Win), wwT_ref[...],
                preferred_element_type=jnp.float32)
    t = t.reshape(Cblk, Hin, Wout).astype(mxu_dtype)
    t = jnp.swapaxes(t, 1, 2)                                    # (Cblk, Wout, Hin)
    # height pass: one (Cblk*Wout, Hin) @ (Hin, Hout) matmul
    u = jnp.dot(t.reshape(Cblk * Wout, Hin), whT_ref[...],
                preferred_element_type=jnp.float32)
    u_ref[...] = u.reshape(Cblk, Wout, Hout).astype(mxu_dtype)


# ----------------------------------------------------------------------------
# Kernel 2: folded 5x5 conv (one deep matmul per Cin block, accumulated over
# the "arbitrary" grid axis) + per-image BatchNorm partial statistics.
#   u block   : (1, 1, Cblk, Sp)    lane-dense flat spatial axis s = w*Hout + h
#   weights   : (1, Cout, 25*Cblk)  tap-major, channel-minor
#   conv out  : (1, Cout, Sp)       resident across the Cin-block axis
#   stats out : (1, Cout, 2)        [sum, sum of squares] over valid columns
# ----------------------------------------------------------------------------
def _conv_bn_stats_kernel(u_ref, w_ref, b_ref, conv_ref, stats_ref, *,
                          nblk, Cblk, Hout, Wout, Sp):
    k = pl.program_id(1)
    Simg = Hout * Wout

    u = u_ref[0, 0]                                              # (Cblk, Sp)

    # lane-index bookkeeping for the flat spatial axis  s = w*Hout + h
    s_idx = lax.broadcasted_iota(jnp.int32, (1, Sp), 1)
    w_idx = s_idx // Hout
    h_idx = s_idx % Hout
    in_img = s_idx < Simg

    def rotate_lanes(v, off):
        # v'[:, s] = v[:, (s + off) mod Sp]; wrap region is masked by caller.
        r = off % Sp
        if r == 0:
            return v
        return jnp.concatenate([v[:, r:], v[:, :r]], axis=1)

    # im2col slab: 25 lane-rotated, boundary-masked copies, tap-major.
    parts = []
    for kh in range(5):
        for kw in range(5):
            dh, dw = kh - 2, kw - 2
            ok = ((h_idx + dh >= 0) & (h_idx + dh < Hout)
                  & (w_idx + dw >= 0) & (w_idx + dw < Wout) & in_img)
            parts.append(jnp.where(ok, rotate_lanes(u, dw * Hout + dh),
                                   jnp.zeros((), u.dtype)))
    slab = jnp.concatenate(parts, axis=0)                        # (25*Cblk, Sp)

    # single deep-contraction conv matmul (f32 accumulation on the MXU)
    acc = jnp.dot(w_ref[0], slab, preferred_element_type=jnp.float32)

    @pl.when(k == 0)
    def _store():
        conv_ref[0] = acc

    @pl.when(k > 0)
    def _accumulate():
        conv_ref[0] = conv_ref[0] + acc

    @pl.when(k == nblk - 1)
    def _finalize():
        c = conv_ref[0] + b_ref[...]                             # (Cout, Sp)
        conv_ref[0] = c
        cm = jnp.where(in_img, c, 0.0)
        ssum = jnp.sum(cm, axis=1, keepdims=True)                # (Cout, 1)
        ssq = jnp.sum(cm * cm, axis=1, keepdims=True)            # (Cout, 1)
        stats_ref[0] = jnp.concatenate([ssum, ssq], axis=1)      # (Cout, 2)


# ----------------------------------------------------------------------------
# Kernel 3: apply the BatchNorm affine normalization (elementwise, tiled)
# ----------------------------------------------------------------------------
def _bn_apply_kernel(conv_ref, scale_ref, shift_ref, o_ref):
    s = scale_ref[...]                                           # (Cout, 1)
    b = shift_ref[...]                                           # (Cout, 1)
    o_ref[...] = conv_ref[...] * s[None] + b[None]


# ----------------------------------------------------------------------------
# Wrapper: parameter packing / layout glue + three pallas_calls
# ----------------------------------------------------------------------------
def upsample_forward(x, size, conv_w, conv_b, gamma, beta, *,
                     mxu_dtype=jnp.bfloat16, eps=1e-5):
    """x: (N, Cin, Hin, Win) NCHW float32.  Returns (N, Cout, Hout, Wout)."""
    f32 = jnp.float32
    N, Cin, Hin, Win = x.shape
    Hout, Wout = size
    Cout = conv_w.shape[0]
    Simg = Hout * Wout
    Sp = _round_up(Simg, 128)            # lane-dense flat spatial axis

    # Cin blocking: 25*Cblk is the contraction depth of the folded conv matmul.
    Cblk = Cin if Cin < 5 else 5
    nblk = -(-Cin // Cblk)
    Cin_pad = nblk * Cblk

    # interpolation matrices (transposed so the kernel contracts the last dim)
    whT = bilinear_weights(Hout, Hin).T.astype(mxu_dtype)        # (Hin, Hout)
    wwT = bilinear_weights(Wout, Win).T.astype(mxu_dtype)        # (Win, Wout)

    # input planes ordered [n][cin-block][ci] along axis 0 (zero-padded Cin)
    xp = jnp.pad(x, ((0, 0), (0, Cin_pad - Cin), (0, 0), (0, 0)))
    xp = xp.reshape(N * Cin_pad, Hin, Win).astype(mxu_dtype)

    # conv weights: (nblk, Cout, 25*Cblk), columns ordered tap-major, ci-minor
    wp = jnp.pad(conv_w, ((0, 0), (0, Cin_pad - Cin), (0, 0), (0, 0)))
    wp = wp.reshape(Cout, nblk, Cblk, 25)
    wp = wp.transpose(1, 0, 3, 2).reshape(nblk, Cout, 25 * Cblk).astype(mxu_dtype)
    cb = conv_b.reshape(Cout, 1).astype(f32)

    vmem_limit = 32 * 1024 * 1024

    # ---- 1) bilinear upsample (grid over channel blocks, fully parallel) ----
    up = pl.pallas_call(
        functools.partial(_upsample_kernel, Cblk=Cblk, Hin=Hin, Win=Win,
                          Hout=Hout, Wout=Wout, mxu_dtype=mxu_dtype),
        out_shape=jax.ShapeDtypeStruct((N * Cin_pad, Wout, Hout), mxu_dtype),
        grid=(N * nblk,),
        in_specs=[
            pl.BlockSpec((Cblk, Hin, Win), lambda i: (i, 0, 0)),
            pl.BlockSpec((Win, Wout), lambda i: (0, 0)),
            pl.BlockSpec((Hin, Hout), lambda i: (0, 0)),
        ],
        out_specs=pl.BlockSpec((Cblk, Wout, Hout), lambda i: (i, 0, 0)),
        compiler_params=pltpu.CompilerParams(
            dimension_semantics=("parallel",),
            vmem_limit_bytes=vmem_limit),
    )(xp, wwT, whT)

    # flatten the (w, h) spatial dims to one lane-dense axis (HBM metadata /
    # cheap XLA glue), pad it to a multiple of 128 for the conv kernel.
    u4 = up.reshape(N, nblk, Cblk, Simg)
    if Sp > Simg:
        u4 = jnp.pad(u4, ((0, 0), (0, 0), (0, 0), (0, Sp - Simg)))

    # ---- 2) folded conv + BN partial statistics -----------------------------
    conv_flat, stats = pl.pallas_call(
        functools.partial(_conv_bn_stats_kernel, nblk=nblk, Cblk=Cblk,
                          Hout=Hout, Wout=Wout, Sp=Sp),
        out_shape=(jax.ShapeDtypeStruct((N, Cout, Sp), f32),
                   jax.ShapeDtypeStruct((N, Cout, 2), f32)),
        grid=(N, nblk),
        in_specs=[
            pl.BlockSpec((1, 1, Cblk, Sp), lambda n, k: (n, k, 0, 0)),
            pl.BlockSpec((1, Cout, 25 * Cblk), lambda n, k: (k, 0, 0)),
            pl.BlockSpec((Cout, 1), lambda n, k: (0, 0)),
        ],
        out_specs=(
            pl.BlockSpec((1, Cout, Sp), lambda n, k: (n, 0, 0)),
            pl.BlockSpec((1, Cout, 2), lambda n, k: (n, 0, 0)),
        ),
        compiler_params=pltpu.CompilerParams(
            dimension_semantics=("parallel", "arbitrary"),
            vmem_limit_bytes=vmem_limit),
    )(u4, wp, cb)

    # ---- finalize the BN statistics (tiny per-channel math, XLA glue) ------
    total = float(N * Simg)
    ssum = jnp.sum(stats[:, :, 0], axis=0)
    ssq = jnp.sum(stats[:, :, 1], axis=0)
    mean = ssum / total
    var = ssq / total - mean * mean                      # biased (training) var
    scale = (gamma.astype(f32) * lax.rsqrt(var + eps)).reshape(Cout, 1)
    shift = (beta.astype(f32) - mean * scale[:, 0]).reshape(Cout, 1)

    # ---- 3) apply the normalization (lane-dense elementwise tiles) ---------
    TS = math.gcd(Sp, 512)
    out_flat = pl.pallas_call(
        _bn_apply_kernel,
        out_shape=jax.ShapeDtypeStruct((N, Cout, Sp), f32),
        grid=(N, Sp // TS),
        in_specs=[
            pl.BlockSpec((1, Cout, TS), lambda n, j: (n, 0, j)),
            pl.BlockSpec((Cout, 1), lambda n, j: (0, 0)),
            pl.BlockSpec((Cout, 1), lambda n, j: (0, 0)),
        ],
        out_specs=pl.BlockSpec((1, Cout, TS), lambda n, j: (n, 0, j)),
        compiler_params=pltpu.CompilerParams(
            dimension_semantics=("parallel", "parallel"),
            vmem_limit_bytes=vmem_limit),
    )(conv_flat, scale, shift)

    # back to NCHW: flat columns are s = w*Hout + h
    out = out_flat[:, :, :Simg].reshape(N, Cout, Wout, Hout)
    return jnp.transpose(out, (0, 1, 3, 2))


# ----------------------------------------------------------------------------
# Pure-JAX reference (same math, XLA ops) for a sanity check
# ----------------------------------------------------------------------------
def reference(x, size, conv_w, conv_b, gamma, beta):
    Hout, Wout = size
    Hin, Win = x.shape[2], x.shape[3]
    wh = bilinear_weights(Hout, Hin)
    ww = bilinear_weights(Wout, Win)
    up = jnp.einsum('ph,nchw->ncpw', wh, x)
    up = jnp.einsum('qw,ncpw->ncpq', ww, up)
    conv = lax.conv_general_dilated(
        up, conv_w, window_strides=(1, 1), padding=((2, 2), (2, 2)),
        dimension_numbers=('NCHW', 'OIHW', 'NCHW'))
    conv = conv + conv_b.reshape(1, -1, 1, 1)
    mean = jnp.mean(conv, axis=(0, 2, 3), keepdims=True)
    var = jnp.mean((conv - mean) ** 2, axis=(0, 2, 3), keepdims=True)
    return (gamma.reshape(1, -1, 1, 1) * (conv - mean)
            * lax.rsqrt(var + 1e-5) + beta.reshape(1, -1, 1, 1))


if __name__ == "__main__":
    key = jax.random.PRNGKey(0)
    k1, k2, k3, k4, k5 = jax.random.split(key, 5)

    N, Cin, Hin, Win = 2, 4, 8, 8
    Cout = 8
    size = (16, 16)

    x = jax.random.normal(k1, (N, Cin, Hin, Win), jnp.float32)
    fan_in = Cin * 5 * 5
    conv_w = jax.random.normal(k2, (Cout, Cin, 5, 5), jnp.float32) / math.sqrt(fan_in)
    conv_b = 0.1 * jax.random.normal(k3, (Cout,), jnp.float32)
    gamma = 1.0 + 0.1 * jax.random.normal(k4, (Cout,), jnp.float32)
    beta = 0.1 * jax.random.normal(k5, (Cout,), jnp.float32)
    # TODO(synk): BatchNorm running_mean/running_var buffer updates (training
    # side effect) are not materialized; only the forward output is produced.

    ref = reference(x, size, conv_w, conv_b, gamma, beta)

    # exact path: f32 MXU operands
    out_f32 = upsample_forward(x, size, conv_w, conv_b, gamma, beta,
                               mxu_dtype=jnp.float32)
    jax.block_until_ready(out_f32)
    assert out_f32.shape == (N, Cout, size[0], size[1]), out_f32.shape
    err_f32 = float(jnp.max(jnp.abs(out_f32 - ref)))
    assert err_f32 < 1e-3, f"f32 path max abs err {err_f32}"

    # fast path: bf16 MXU operands, f32 accumulation (v6e/v7x friendly);
    # tolerance loosened for bf16 operand rounding.
    out_bf16 = upsample_forward(x, size, conv_w, conv_b, gamma, beta,
                                mxu_dtype=jnp.bfloat16)
    jax.block_until_ready(out_bf16)
    err_bf16 = float(jnp.max(jnp.abs(out_bf16 - ref)))
    assert err_bf16 < 1e-1, f"bf16 path max abs err {err_bf16}"

    print("KERNEL_OK")
</pallas_src>

<mosaic_0001>
module attributes {stable_mosaic.version = 11 : i64} {
  func.func @_upsample_kernel(%arg0: i32, %arg1: memref<4x8x8xf32, #tpu.memory_space<vmem>>, %arg2: memref<8x16xf32, #tpu.memory_space<vmem>>, %arg3: memref<8x16xf32, #tpu.memory_space<vmem>>, %arg4: memref<4x16x16xf32, #tpu.memory_space<vmem>>) attributes {dimension_semantics = [#tpu.dimension_semantics<parallel>], iteration_bounds = array<i64: 2>, scalar_prefetch = 0 : i64, scratch_operands = 0 : i64, tpu.core_type = #tpu.core_type<tc>, window_params = [{transform_indices = @transform_0, window_bounds = array<i64: 4, 8, 8>}, {pipeline_mode = #tpu.pipeline_mode<synchronous>, transform_indices = @transform_1, window_bounds = array<i64: 8, 16>}, {pipeline_mode = #tpu.pipeline_mode<synchronous>, transform_indices = @transform_2, window_bounds = array<i64: 8, 16>}, {transform_indices = @transform_3, window_bounds = array<i64: 4, 16, 16>}]} {
    %c0 = arith.constant 0 : index
    %c0_0 = arith.constant 0 : index
    %c0_1 = arith.constant 0 : index
    %0 = vector.load %arg1[%c0, %c0_0, %c0_1] : memref<4x8x8xf32, #tpu.memory_space<vmem>>, vector<4x8x8xf32>
    %1 = vector.shape_cast %0 : vector<4x8x8xf32> to vector<32x8xf32>
    %c0_2 = arith.constant 0 : index
    %c0_3 = arith.constant 0 : index
    %2 = vector.load %arg2[%c0_2, %c0_3] : memref<8x16xf32, #tpu.memory_space<vmem>>, vector<8x16xf32>
    %cst = arith.constant dense<0.000000e+00> : vector<32x16xf32>
    %3 = tpu.matmul %1, %2, %cst {dimension_numbers = #tpu.dot_dimension_numbers<[1], [0], [0], [1], [0, 0, 1, 1], [], []>} : vector<32x8xf32>, vector<8x16xf32>, vector<32x16xf32> -> vector<32x16xf32>
    %4 = vector.shape_cast %3 : vector<32x16xf32> to vector<4x8x16xf32>
    %5 = tpu.transpose %4, [0, 2, 1] : vector<4x8x16xf32> -> vector<4x16x8xf32>
    %6 = vector.shape_cast %5 : vector<4x16x8xf32> to vector<64x8xf32>
    %c0_4 = arith.constant 0 : index
    %c0_5 = arith.constant 0 : index
    %7 = vector.load %arg3[%c0_4, %c0_5] : memref<8x16xf32, #tpu.memory_space<vmem>>, vector<8x16xf32>
    %cst_6 = arith.constant dense<0.000000e+00> : vector<64x16xf32>
    %8 = tpu.matmul %6, %7, %cst_6 {dimension_numbers = #tpu.dot_dimension_numbers<[1], [0], [0], [1], [0, 0, 1, 1], [], []>} : vector<64x8xf32>, vector<8x16xf32>, vector<64x16xf32> -> vector<64x16xf32>
    %9 = vector.shape_cast %8 : vector<64x16xf32> to vector<4x16x16xf32>
    %c0_7 = arith.constant 0 : index
    %c0_8 = arith.constant 0 : index
    %c0_9 = arith.constant 0 : index
    %10 = vector.load %arg4[%c0_7, %c0_8, %c0_9] : memref<4x16x16xf32, #tpu.memory_space<vmem>>, vector<4x16x16xf32>
    tpu.vector_store %arg4[%c0_7, %c0_8, %c0_9], %9 {strides = array<i32>} : memref<4x16x16xf32, #tpu.memory_space<vmem>>, vector<4x16x16xf32>,
    return
  }
  func.func @transform_0(%arg0: i32) -> (i32, i32, i32) {
    %c0_i32 = arith.constant 0 : i32
    %c0_i32_0 = arith.constant 0 : i32
    %c0_i32_1 = arith.constant 0 : i32
    return %arg0, %c0_i32, %c0_i32_0 : i32, i32, i32
  }
  func.func @transform_1(%arg0: i32) -> (i32, i32) {
    %c0_i32 = arith.constant 0 : i32
    %c0_i32_0 = arith.constant 0 : i32
    %c0_i32_1 = arith.constant 0 : i32
    return %c0_i32, %c0_i32_0 : i32, i32
  }
  func.func @transform_2(%arg0: i32) -> (i32, i32) {
    %c0_i32 = arith.constant 0 : i32
    %c0_i32_0 = arith.constant 0 : i32
    %c0_i32_1 = arith.constant 0 : i32
    return %c0_i32, %c0_i32_0 : i32, i32
  }
  func.func @transform_3(%arg0: i32) -> (i32, i32, i32) {
    %c0_i32 = arith.constant 0 : i32
    %c0_i32_0 = arith.constant 0 : i32
    %c0_i32_1 = arith.constant 0 : i32
    return %arg0, %c0_i32, %c0_i32_0 : i32, i32, i32
  }
}

</mosaic_0001>

<bundles_post_ra>
// kernel: tpu_custom_call.1
= control target key start
LH: loop header
LB: loop body
LE: loop exit
PB: predicated region body
PF: predicated region fallthrough
CT: control target
= control target key end

     0   :  { %8 = vsyncpa [#allocation3], 0  ;;  %s1275_s0 = inlined_call_operand.hbm [shape: f32[8,8,8], index: 0, kind: input, shape index: {}]   ;;  %s1276_s1 = inlined_call_operand.hbm [shape: f32[8,16], index: 1, kind: input, shape index: {}]   ;;  %s1277_s2 = inlined_call_operand.hbm [shape: f32[8,16], index: 2, kind: input, shape index: {}]   ;;  %s1278_s3 = inlined_call_operand.hbm [shape: f32[8,16,16], index: 3, kind: output, shape index: {}]  }
   0x1   :  { %10 = vsyncpa [#allocation3 + $0x1], 0 }
   0x2   :  { %11 = vsyncpa [#allocation6], 0 }
   0x3   :  { %12 = vsyncpa [#allocation4], 0 }
   0x4   :  { %14 = vsyncpa [#allocation4 + $0x1], 0  ;;  %s1023_s12 = smov 0   ;;  %s1025_s13 = smov 0  }
   0x5   :  { %s1027_s14 = smov 0   ;;  %s1029_s15 = smov 0  }
   0x6 LB: > { %s1044_s16 = sadd.s32 4294967295, %s993_s15   ;;  %s693_s17 = sadd.s32 4294967294, %s993_s15   ;;  %s993_s15 = sphi %s1029_s15, %s1303_s15   ;;  %s989_s14 = sphi %s1027_s14, %s1302_s14   ;;  %s985_s13 = sphi %s1025_s13, %s1301_s13   ;;  %s981_s12 = sphi %s1023_s12, %s1300_s12  }
   0x7   : > { %s1048_s18 = sadd.s32 1, %s993_s15   ;;  %s27_s19 = sadd.s32 1, %s989_s14 }
   0x8   : > { %s24_s20 = ssub.s32 %s993_s15, %s1048_s18  ;;  %p34_p0 = scmp.ne.s32.totalorder %s989_s14, %s985_s13 }
   0x9   : > { %p25_p1 = scmp.eq.s32.totalorder %s24_s20, 0  ;;  %p35_p2 = scmp.eq.s32.totalorder %s993_s15, 0 }
   0xa   : > { %p40_p3 = scmp.ne.s32.totalorder %s985_s13, %s981_s12  ;;  %p1279_p4 = scmp.eq.s32.totalorder %s1044_s16, 0 }
   0xb   : > { %s1060_s21 = scalar_select %p25_p1, %s989_s14, %s27_s19  }
   0xc   : > { %p1062_p5 = por %p35_p2, %p34_p0  ;;  %p1068_p6 = por %p1279_p4, %p40_p3 }
   0xd   : > { %p106_p7 = scmp.eq.s32.totalorder %s1044_s16, 1  ;;  %p112_p8 = scmp.eq.s32.totalorder %s693_s17, 1 }
   0xe   : > { %s1285_s23 = scalar_select %p1068_p6, 1, 0 }
   0xf   : > { %p694_p9 = scmp.ge.s32.totalorder %s993_s15, 1  ;;  %p119_p10 = scmp.lt.s32.totalorder %s993_s15, 3 }
  0x10   : > { %p1075_p11 = por %p106_p7, %p34_p0  ;;  %p1079_p12 = por %p112_p8, %p40_p3 }
  0x11   : > { %p1083_p13 = pnand %p694_p9, %p119_p10  ;;  %s995_s27 = smov [#allocation5]  }
  0x12   : > { %s1286_s24 = scalar_select %p1075_p11, 1, 0 }
  0x13   : > { %s1287_s25 = scalar_select %p1079_p12, 1, 0 }
  0x14   : > { %s1288_s26 = scalar_select %p1083_p13, 1, 0 }
  0x15   : > { %p777_p2 = pneg %p1083_p13  ;;  %s132_s28 = sshll.u32 %s995_s27, 4  ;;  %s133_s28 = int_to_ptr.vmem [resolvable:$true] %s132_s28 }
  0x16   : > { %p794_p4 = scmp.lt.s32.totalorder %s993_s15, 2  ;;  %p1289_p0 = scmp.eq.s32.totalorder %s1044_s16, 0 }
  0x17   : > { %s996_s4 = smov [#allocation7]   ;;  %s837_s8 = scalar_lea.hbm %s1276_s1, 128 }
  0x18   : > { %p1093_p7 = pnand %p777_p2, %p1289_p0  ;;  %p1099_p3 = pnand %p794_p4, %p1062_p5 }
  0x19   : > { %s143_s5 = sshll.u32 %s996_s4, 4  ;;  %p838_p8 = scmp.ne.s32.totalorder %s1276_s1, %s837_s8  ;;  %s1103_s5 = int_to_ptr.vmem [resolvable:$true] %s143_s5 }
  0x1a   : > { %s1291_s30 = scalar_select %p1099_p3, 1, 0 }
  0x1b   : > { %p839_p9 = pneg %p1093_p7  ;;  %p844_p10 = scmp.lt.u32.totalorder %s837_s8, %s1276_s1 }
  0x1d   : > { %p840_p4 = pnand %p839_p9, %p838_p8 }
  0x1f   : > { %p841_p5 = pneg %p840_p4 }
  0x21   : > { %p846_p2 = pnand %p844_p10, %p841_p5 }
  0x23   : > { %849 = shalt.err (!%p846_p2)
}
  0x24   : > { %s850_s19 = scalar_lea.vmem %s133_s28, 128  ;;  %p858_p11 = scmp.lt.s32.totalorder %s133_s28, %s133_s28 }
  0x25   : > { %p851_p0 = scmp.ne.s32.totalorder %s133_s28, %s850_s19  ;;  %p859_p6 = scmp.lt.s32.totalorder %s850_s19, %s850_s19 }
  0x27   : > { %p853_p1 = pnand %p851_p0, %p839_p9  ;;  %p860_p13 = por %p859_p6, %p858_p11 }
  0x29   : > { %p854_p12 = pneg %p853_p1 }
  0x2b   : > { %p861_p3 = pnand %p860_p13, %p854_p12 }
  0x2d   : > { %864 = shalt.err (!%p861_p3)
}
  0x2e   : > { %780 = dma.hbm_to_vmem [thread:$0]  (!%p1093_p7), %s1276_s1, 128, %s133_s28, [#allocation6]  }
  0x2f   : > { %s154_s27 = sand.u32 1, %s989_s14   ;;  %s865_s7 = scalar_lea.hbm %s1277_s2, 128 }
  0x30   : > { %p866_p1 = scmp.ne.s32.totalorder %s1277_s2, %s865_s7  ;;  %p872_p12 = scmp.lt.u32.totalorder %s865_s7, %s1277_s2 }
  0x32   : > { %p868_p6 = pnand %p866_p1, %p839_p9 }
  0x34   : > { %p869_p11 = pneg %p868_p6 }
  0x36   : > { %p874_p13 = pnand %p872_p12, %p869_p11 }
  0x38   : > { %877 = shalt.err (!%p874_p13)
}
  0x39   : > { %s878_s28 = scalar_lea.vmem %s1103_s5, 128  ;;  %p886_p5 = scmp.lt.s32.totalorder %s1103_s5, %s1103_s5 }
  0x3a   : > { %p879_p3 = scmp.ne.s32.totalorder %s1103_s5, %s878_s28  ;;  %p887_p10 = scmp.lt.s32.totalorder %s878_s28, %s878_s28 }
  0x3c   : > { %p881_p8 = pnand %p879_p3, %p839_p9  ;;  %p888_p2 = por %p887_p10, %p886_p5 }
  0x3e   : > { %p882_p4 = pneg %p881_p8 }
  0x40   : > { %p889_p0 = pnand %p888_p2, %p882_p4 }
  0x42   : > { %892 = shalt.err (!%p889_p0)
}
  0x43   : > { %783 = dma.hbm_to_vmem [thread:$0]  (!%p1093_p7), %s1277_s2, 128, %s1103_s5, [#allocation6]  }
  0x44   : > { %s698_s20 = sshll.u32 %s154_s27, 5  ;;  %s724_s22 = sshll.u32 %s993_s15, 9 }
  0x45   : > { %s1157_s7 = scalar_lea.hbm %s1275_s0, %s724_s22  ;;  %s158_s29 = scalar_lea.vmem [#allocation2], %s698_s20 }
  0x46   : > { %s165_s8 = sshll.u32 %s158_s29, 4  ;;  %s1161_s9 = scalar_lea.sflag [#allocation3], %s154_s27  ;;  %s1159_s8 = int_to_ptr.vmem [resolvable:$true] %s165_s8 }
  0x47   : > { %s893_s10 = scalar_lea.hbm %s1157_s7, 512  ;;  %p1292_p7 = scmp.ne.s32.totalorder %s1291_s30, 0 }
  0x48   : > { %p894_p9 = scmp.ne.s32.totalorder %s1157_s7, %s893_s10  ;;  %s898_s28 = scalar_lea.hbm %s1275_s0, 1024 }
  0x49   : > { %p895_p1 = pneg %p1292_p7  ;;  %p899_p12 = scmp.lt.u32.totalorder %s1157_s7, %s1275_s0 }
  0x4a   : > { %p900_p13 = scmp.lt.u32.totalorder %s898_s28, %s893_s10  ;;  %p902_p8 = scmp.lt.u32.totalorder %s893_s10, %s1157_s7 }
  0x4b   : > { %p896_p6 = pnand %p895_p1, %p894_p9 }
  0x4c   : > { %p901_p3 = por %p900_p13, %p899_p12 }
  0x4d   : > { %p897_p11 = pneg %p896_p6 }
  0x4e   : > { %p903_p4 = por %p902_p8, %p901_p3 }
  0x50   : > { %p904_p5 = pnand %p903_p4, %p897_p11 }
  0x52   : > { %907 = shalt.err (!%p904_p5)
}
  0x53   : > { %s908_s27 = scalar_lea.vmem %s1159_s8, 512  ;;  %s997_s20 = smov [#allocation2]  }
  0x54   : > { %p909_p10 = scmp.ne.s32.totalorder %s1159_s8, %s908_s27  ;;  %s913_s22 = sshll.u32 %s997_s20, 4  ;;  %s914_s22 = int_to_ptr.vmem [resolvable:$false] %s913_s22 }
  0x55   : > { %s915_s4 = scalar_lea.vmem %s914_s22, 1024  ;;  %p916_p9 = scmp.lt.s32.totalorder %s1159_s8, %s914_s22 }
  0x56   : > { %p911_p2 = pnand %p909_p10, %p895_p1  ;;  %p917_p6 = scmp.lt.s32.totalorder %s915_s4, %s908_s27 }
  0x58   : > { %p912_p0 = pneg %p911_p2  ;;  %p918_p12 = por %p917_p6, %p916_p9 }
  0x5a   : > { %p919_p13 = pnand %p918_p12, %p912_p0 }
  0x5c   : > { %922 = shalt.err (!%p919_p13)
}
  0x5d   : > { %s998_s6 = smov 128   ;;  %s999_s29 = smov 8  }
  0x5e   : > { %787 = dma.hbm_to_vmem [thread:$0]  (!%p1292_p7), %s1157_s7, 512, %s1159_s8, %s1161_s9, %s998_s6, %s998_s6, %s999_s29  }
  0x5f   : > { %p1293_p1 = scmp.ne.s32.totalorder %s1288_s26, 0 }
  0x60   : > { %s1192_s10 = sand.u32 (!%p1293_p1), 1, %s985_s13   ;;  %p1294_p11 = scmp.ne.s32.totalorder (!%p1293_p1), %s1285_s23, 0 }
  0x61   : > { %177 = sbr.rel (%p1293_p1) target bundleno = 696 (0x2b8), region = 32  ;;  %s702_s5 = sshll.u32 (!%p1293_p1), %s1192_s10, 5 }
  0x62   : > { %s180_s11 = scalar_lea.sflag (!%p1293_p1), [#allocation3], %s1192_s10  ;;  %s183_s28 = scalar_lea.vmem (!%p1293_p1), [#allocation2], %s702_s5 }
  0x68   : > { %968 = dma.done.wait (%p1294_p11), %s180_s11, 512  }
  0x69   : > { %970 = vsyncadd (%p1294_p11), %s180_s11, 4294966784  ;;  %p1295_p3 = scmp.eq.s32.totalorder %s1044_s16, 0 }
  0x6b   : > { %972 = dma.done.wait (%p1295_p3), [#allocation6], 256   ;;  %p1296_p7 = pmov %p1295_p3 }
  0x6c   : > { %vm221_vm0 = vcmask 64512   ;;  %v220_v0 = vld [vmem:[#allocation5] sm:$0xff]  ;;  %v217_v2 = vld [vmem:[%s183_s28 + $0x8] sm:$0xff]  ;;  %v218_v3 = vld [vmem:[%s183_s28 + $0x10] sm:$0xff]  ;;  %s705_s23 = sshll.u32 %s1192_s10, 6  ;;  %vm577_vm1 = vcmask 130048  }
  0x6d   : > { %974 = vsyncadd (%p1296_p7), [#allocation6], 4294967040  ;;  %v216_v1 = vld [vmem:[%s183_s28] sm:$0xff]  ;;  %741 = vmatprep.subr.mxu0 %v220_v0  ;;  %v219_v4 = vld [vmem:[%s183_s28 + $0x18] sm:$0xff]  ;;  %s213_s26 = scalar_lea.vmem [#allocation8], %s705_s23  ;;  %s726_s7 = sshll.u32 %s1044_s16, 10 }
  0x6e   : > { %743 = vmatprep.mubr.msk.f32.mxu0 %vm221_vm0, %v216_v1  ;;  %742 = vmatpush3.msra.mxu0 %v220_v0  ;;  %v447_v7 = vld [vmem:[#allocation7] sm:$0xff]  ;;  %s601_s30 = sshll.u32 %s213_s26, 4  ;;  %s1229_s17 = scalar_lea.hbm %s1278_s3, %s726_s7  ;;  %s1223_s30 = int_to_ptr.vmem [resolvable:$true] %s601_s30 }
  0x6f   : > { %744 = vmatmul.mubr.msk.f32.vlgmr.msra.gmra.mrb[0].mxu0 %vm221_vm0, %v217_v2  ;;  %763 = vmatprep.subr.mxu1 %v447_v7  ;;  %s587_s16 = scalar_lea.sflag [#allocation4], %s1192_s10  ;;  %s923_s19 = scalar_lea.vmem %s1223_s30, 1024 }
  0x70   : > { %746 = vmatprep.mubr.msk.f32.mxu0 %vm221_vm0, %v218_v3  ;;  %749 = vmatprep.subr.mxu0 %v447_v7  ;;  %p924_p8 = scmp.ne.s32.totalorder %s1223_s30, %s923_s19  ;;  %p1297_p4 = scmp.ne.s32.totalorder %s1286_s24, 0 }
  0x71   : > { %764 = vmatpush3.msra.mxu1 %v447_v7  ;;  %750 = vmatpush3.msra.mxu0 %v447_v7  ;;  %s1000_s27 = smov [#allocation8]  }
  0x72   : > { %p925_p5 = pnand %p924_p8, %p1297_p4  ;;  %s927_s20 = sshll.u32 %s1000_s27, 4  ;;  %s928_s20 = int_to_ptr.vmem [resolvable:$false] %s927_s20 }
  0x73   : > { %747 = vmatmul.mubr.msk.f32.gmra.mrb[2].mxu0 %vm221_vm0, %v219_v4  ;;  %s929_s22 = scalar_lea.vmem %s928_s20, 2048  ;;  %p930_p2 = scmp.lt.s32.totalorder %s1223_s30, %s928_s20 }
  0x74   : > { %p926_p10 = pneg %p925_p5  ;;  %p931_p0 = scmp.lt.s32.totalorder %s929_s22, %s923_s19 }
  0x76   : > { %p932_p9 = por %p931_p0, %p930_p2 }
  0x78   : > { %p933_p6 = pnand %p932_p9, %p926_p10 }
 0x142   : > { %v745_v5 = vpop.f32.mrb[0].mxu0 }
 0x143   : > { %351 = vxpose.xlu0.b32.start.end [1/1] (short) (narrow) %v745_v5, 16  ;;  %v300_v6 = vpop.f32.mrb[1].mxu0 }
 0x144   : > { %319 = vxpose.xlu1.b32.start.end [1/1] (short) (narrow) %v300_v6, 16 }
 0x146   : > { %v748_v8 = vpop.f32.mrb[2].mxu0 }
 0x147   : > { %v310_v9 = vpop.f32.mrb[3].mxu0 }
 0x148   : > { %383 = vxpose.xlu0.b32.start.end [1/1] (short) (narrow) %v310_v9, 16 }
 0x149   : > { %415 = vxpose.xlu1.b32.start.end [1/1] (short) (narrow) %v748_v8, 16 }
 0x1c3   : > { %v367_v10 = vpop.trf.xlu0 }
 0x1c4   : > { %754 = vmatprep.mubr.msk.f32.mxu1 %vm221_vm0, %v367_v10  ;;  %v335_v11 = vpop.trf.xlu1 }
 0x1c5   : > { %751 = vmatprep.mubr.msk.f32.mxu0 %vm221_vm0, %v335_v11 }
 0x1c7   : > { %v368_v12 = vpop.trf.xlu0 }
 0x1c8   : > { %755 = vmatmul.mubr.msk.f32.vlgmr.msra.gmra.mrb[0].mxu1 %vm221_vm0, %v368_v12  ;;  %v336_v13 = vpop.trf.xlu1 }
 0x1c9   : > { %752 = vmatmul.mubr.msk.f32.vlgmr.msra.gmra.mrb[4].mxu0 %vm221_vm0, %v336_v13 }
 0x1cb   : > { %v399_v14 = vpop.trf.xlu0 }
 0x1cc   : > { %757 = vmatprep.mubr.msk.f32.mxu1 %vm221_vm0, %v399_v14  ;;  %v431_v15 = vpop.trf.xlu1 }
 0x1cf   : > { %v400_v16 = vpop.trf.xlu0 }
 0x1d0   : > { %758 = vmatmul.mubr.msk.f32.gmra.mrb[2].mxu1 %vm221_vm0, %v400_v16  ;;  %v432_v17 = vpop.trf.xlu1 }
 0x1d1   : > { %760 = vmatprep.mubr.msk.f32.mxu1 %vm221_vm0, %v431_v15 }
 0x1d4   : > { %761 = vmatmul.mubr.msk.f32.gmra.mrb[4].mxu1 %vm221_vm0, %v432_v17 }
 0x29b   : > { %v756_v18 = vpop.f32.mrb[0].mxu1 }
 0x29c   : > { %581 = vst.msk [vmem:[%s213_s26 + $0x18] sm:$0xff] %vm577_vm1, %v756_v18  ;;  %v548_v19 = vpop.f32.mrb[1].mxu1  ;;  %v753_v20 = vpop.f32.mrb[4].mxu0 }
 0x29d   : > { %580 = vst.msk [vmem:[%s213_s26 + $0x10] sm:$0xff] %vm577_vm1, %v548_v19  ;;  %579 = vst.msk [vmem:[%s213_s26 + $0x8] sm:$0xff] %vm577_vm1, %v753_v20  ;;  %v538_v21 = vpop.f32.mrb[5].mxu0 }
 0x29e   : > { %578 = vst.msk [vmem:[%s213_s26] sm:$0xff] %vm577_vm1, %v538_v21 }
 0x2a3   : > { %v759_v22 = vpop.f32.mrb[2].mxu1 }
 0x2a4   : > { %583 = vst.msk [vmem:[%s213_s26 + $0x28] sm:$0xff] %vm577_vm1, %v759_v22  ;;  %v558_v23 = vpop.f32.mrb[3].mxu1 }
 0x2a5   : > { %582 = vst.msk [vmem:[%s213_s26 + $0x20] sm:$0xff] %vm577_vm1, %v558_v23 }
 0x2a7   : > { %v762_v24 = vpop.f32.mrb[4].mxu1 }
 0x2a8   : > { %585 = vst.msk [vmem:[%s213_s26 + $0x38] sm:$0xff] %vm577_vm1, %v762_v24  ;;  %v568_v25 = vpop.f32.mrb[5].mxu1 }
 0x2a9   : > { %584 = vst.msk [vmem:[%s213_s26 + $0x30] sm:$0xff] %vm577_vm1, %v568_v25 }
 0x2aa   : > { %936 = shalt.err (!%p933_p6)
}
 0x2ab   : > { %s937_s4 = scalar_lea.hbm %s1229_s17, 1024  ;;  %s941_s5 = scalar_lea.hbm %s1278_s3, 2048 }
 0x2ac   : > { %p938_p12 = scmp.ne.s32.totalorder %s1229_s17, %s937_s4  ;;  %p942_p11 = scmp.lt.u32.totalorder %s1229_s17, %s1278_s3 }
 0x2ad   : > { %p943_p3 = scmp.lt.u32.totalorder %s941_s5, %s937_s4  ;;  %p945_p8 = scmp.lt.u32.totalorder %s937_s4, %s1229_s17 }
 0x2ae   : > { %p939_p13 = pnand %p938_p12, %p1297_p4 }
 0x2af   : > { %p944_p7 = por %p943_p3, %p942_p11 }
 0x2b0   : > { %p940_p1 = pneg %p939_p13 }
 0x2b1   : > { %p946_p5 = por %p945_p8, %p944_p7 }
 0x2b3   : > { %p947_p10 = pnand %p946_p5, %p940_p1 }
 0x2b5   : > { %950 = shalt.err (!%p947_p10)
}
 0x2b6   : > { %s1001_s23 = smov 128   ;;  %s1002_s26 = smov 8  }
 0x2b7   : > { %775 = dma.vmem_to_hbm [thread:$0]  (%p1297_p4), %s1223_s30, 1024, %s1229_s17, %s587_s16, %s1001_s23, %s1001_s23, %s1002_s26  }
 0x2b8 PF: > { %s616_s7 = sand.u32 1, %s981_s12   ;;  %p1298_p2 = scmp.ne.s32.totalorder %s1287_s25, 0 }
 0x2b9   : > { %p1299_p0 = scmp.ge.s32.totalorder %s993_s15, 2  ;;  %s617_s8 = scalar_lea.sflag [#allocation4], %s616_s7 }
 0x2bb   : > { %p789_p9 = pnand %p1299_p0, %p1298_p2 }
 0x2bd   : > { %976 = dma.done.wait (!%p789_p9), %s617_s8, 1024  }
 0x2be   : > { %978 = vsyncadd (!%p789_p9), %s617_s8, 4294966272  ;;  %p17_p6 = scmp.ge.s32.totalorder %s1048_s18, 4   ;;  %s1300_s12 = smov %s985_s13 }
 0x2bf   : > { %s1301_s13 = smov %s989_s14  ;;  %s1302_s14 = smov %s1060_s21 }
 0x2c0   : > { %s1303_s15 = smov %s1048_s18  ;;  %19 = sbr.rel (!%p17_p6) target bundleno = 6 (0x6), region = 85 }
 0x2c7   :  { %622 = vsyncpa [#allocation3], 1 }
 0x2c8   :  { %624 = vsyncpa [#allocation3 + $0x1], 1 }
 0x2c9   :  { %625 = vsyncpa [#allocation6], 1 }
 0x2ca   :  { %626 = vsyncpa [#allocation4], 1 }
 0x2cb   :  { %628 = vsyncpa [#allocation4 + $0x1], 1 }

</bundles_post_ra>
